<compile_context>
chip_gen: v7x
topology: tpu7x:2x2x1
jax: 0.10.0
libtpu: 0.0.40
codegen_flags: <defaults>
</compile_context>

<pallas_src>
import functools

import jax
import jax.numpy as jnp
from jax.experimental import pallas as pl
from jax.experimental.pallas import tpu as pltpu


def _mlp_kernel(hidden_dtype, xt_ref, w1_ref, b1_ref, w2_ref, b2_ref, o_ref):
    # Fused: matmul + bias + ReLU + matmul + bias on one lane-dense batch tile.
    xt = xt_ref[...]                                                     # (4,  TB) f32
    h = jnp.dot(w1_ref[...], xt, preferred_element_type=jnp.float32)     # (64, TB) f32 (MXU)
    h = jnp.maximum(h + b1_ref[...], 0.0)                                # bias bcast over lanes + ReLU (f32: v5e-safe)
    h = h.astype(hidden_dtype)                                           # bf16 by default: halves vst traffic / VMEM
    y = jnp.dot(w2_ref[...], h, preferred_element_type=jnp.float32)      # (3,  TB) f32 accumulate (MXU)
    o_ref[...] = (y + b2_ref[...]).astype(o_ref.dtype)


def _round_up(x, m):
    return ((x + m - 1) // m) * m


def _pick_tile(B, tb, bytes_per_col):
    """Lane-dense batch tile: multiple of 128, >=2 grid steps when possible, VMEM-capped."""
    vmem_cap = 44 * 1024 * 1024                       # conservative per-step cap (v7x-safe)
    tb_cap = max(128, (vmem_cap // bytes_per_col) // 128 * 128)
    tb = min(tb, tb_cap)
    if B < 256:
        return B                                      # tiny batch: single full-extent block
    # Keep at least 2 grid steps so both TensorCores on v7x get work (no-op on 1-TC chips).
    return min(tb, _round_up(pl.cdiv(B, 2), 128))


def simple_nn_forward_t(x_t, w1, b1, w2, b2, *, tb=32768, hidden_dtype=jnp.bfloat16):
    """Layout-native entry point: x_t (4, B) f32 -> (3, B) f32.  No wrapper transposes."""
    in_dim, B = x_t.shape
    out_dim = w2.shape[0]
    hid_dim = w1.shape[0]
    assert tb % 128 == 0

    hid_isize = jnp.dtype(hidden_dtype).itemsize
    # Per batch-column VMEM: double-buffered x/y blocks + f32 matmul result (+ bf16 copy).
    bytes_per_col = 2 * 4 * (in_dim + out_dim) + 4 * hid_dim + (hid_isize * hid_dim if hid_isize < 4 else 0)
    TB = _pick_tile(B, tb, bytes_per_col)
    grid = (pl.cdiv(B, TB),)

    # Explicit scoped-VMEM request: v5e's default is only 16 MiB; stay <= 48 MiB for v7x.
    vmem_need = bytes_per_col * TB + (1 << 20)
    vmem_limit = int(min(max(32 << 20, int(vmem_need * 1.25)), 48 << 20))

    w2c = w2.astype(hidden_dtype)      # pre-cast once: bf16 weights for the second MXU matmul
    kernel = functools.partial(_mlp_kernel, hidden_dtype)

    return pl.pallas_call(
        kernel,
        out_shape=jax.ShapeDtypeStruct((out_dim, B), jnp.float32),
        grid=grid,
        in_specs=[
            # Streamed activations, tiled along the batch (lane) axis -> lane-dense DMA/loads.
            pl.BlockSpec((in_dim, TB), lambda i: (0, i),
                         memory_space=pltpu.MemorySpace.VMEM),
            # Weights / biases: same block index every step -> loaded once, VMEM-resident.
            pl.BlockSpec(w1.shape, lambda i: (0, 0), memory_space=pltpu.MemorySpace.VMEM),
            pl.BlockSpec(b1.shape, lambda i: (0, 0), memory_space=pltpu.MemorySpace.VMEM),
            pl.BlockSpec(w2c.shape, lambda i: (0, 0), memory_space=pltpu.MemorySpace.VMEM),
            pl.BlockSpec(b2.shape, lambda i: (0, 0), memory_space=pltpu.MemorySpace.VMEM),
        ],
        out_specs=pl.BlockSpec((out_dim, TB), lambda i: (0, i),
                               memory_space=pltpu.MemorySpace.VMEM),
        compiler_params=pltpu.CompilerParams(
            dimension_semantics=("parallel",),        # independent batch tiles (megacore-shardable)
            vmem_limit_bytes=vmem_limit,
        ),
    )(x_t, w1, b1, w2c, b2)


def simple_nn_forward(x, w1, b1, w2, b2, **kwargs):
    """Torch-contract entry point: x (B, 4) f32 -> (B, 3) f32.

    Pays one transpose each way in the wrapper.  Producers/consumers that can work in the
    (features, batch) layout should call simple_nn_forward_t directly and skip both.
    """
    return simple_nn_forward_t(x.T, w1, b1, w2, b2, **kwargs).T


def init_params(key):
    # Deterministic, torch-Linear-like uniform(-1/sqrt(fan_in), 1/sqrt(fan_in)) init,
    # stored in torch layout: weight (out_features, in_features), bias (out_features, 1).
    k1, k2, k3, k4 = jax.random.split(key, 4)
    lim1 = 1.0 / jnp.sqrt(4.0)
    lim2 = 1.0 / jnp.sqrt(64.0)
    w1 = jax.random.uniform(k1, (64, 4), jnp.float32, -lim1, lim1)
    b1 = jax.random.uniform(k2, (64, 1), jnp.float32, -lim1, lim1)
    w2 = jax.random.uniform(k3, (3, 64), jnp.float32, -lim2, lim2)
    b2 = jax.random.uniform(k4, (3, 1), jnp.float32, -lim2, lim2)
    return w1, b1, w2, b2


if __name__ == "__main__":
    key = jax.random.PRNGKey(0)
    kx, kp = jax.random.split(key)
    w1, b1, w2, b2 = init_params(kp)

    def ref_forward(xv):
        h = jnp.maximum(xv @ w1.T + b1[:, 0], 0.0)
        return h @ w2.T + b2[:, 0]

    # Small-shape check (single full-extent block path), exact f32 hidden.
    x_small = jax.random.normal(kx, (8, 4), jnp.float32)
    out_small = jax.block_until_ready(
        simple_nn_forward(x_small, w1, b1, w2, b2, hidden_dtype=jnp.float32))
    assert out_small.shape == (8, 3)
    assert jnp.allclose(out_small, ref_forward(x_small), atol=1e-4, rtol=1e-4)

    # Gridded path: >=2 lane-dense batch tiles + partial last tile, default bf16 hidden.
    x_big = jax.random.normal(kx, (1000, 4), jnp.float32)
    out_big = jax.block_until_ready(simple_nn_forward(x_big, w1, b1, w2, b2))
    assert out_big.shape == (1000, 3)
    assert jnp.allclose(out_big, ref_forward(x_big), atol=2e-2, rtol=2e-2)

    # Layout-native entry point (no wrapper transposes), exact f32 hidden.
    out_t = jax.block_until_ready(
        simple_nn_forward_t(x_big.T, w1, b1, w2, b2, hidden_dtype=jnp.float32))
    assert out_t.shape == (3, 1000)
    assert jnp.allclose(out_t.T, ref_forward(x_big), atol=1e-4, rtol=1e-4)

    print("KERNEL_OK")
</pallas_src>

<mosaic_0001>
module attributes {stable_mosaic.version = 11 : i64} {
  func.func @_mlp_kernel(%arg0: i32, %arg1: memref<4x8xf32, #tpu.memory_space<vmem>>, %arg2: memref<64x4xf32, #tpu.memory_space<vmem>>, %arg3: memref<64x1xf32, #tpu.memory_space<vmem>>, %arg4: memref<3x64xf32, #tpu.memory_space<vmem>>, %arg5: memref<3x1xf32, #tpu.memory_space<vmem>>, %arg6: memref<3x8xf32, #tpu.memory_space<vmem>>) attributes {dimension_semantics = [#tpu.dimension_semantics<parallel>], iteration_bounds = array<i64: 1>, scalar_prefetch = 0 : i64, scratch_operands = 0 : i64, tpu.core_type = #tpu.core_type<tc>, window_params = [{transform_indices = @transform_0, window_bounds = array<i64: 4, 8>}, {pipeline_mode = #tpu.pipeline_mode<synchronous>, transform_indices = @transform_1, window_bounds = array<i64: 64, 4>}, {pipeline_mode = #tpu.pipeline_mode<synchronous>, transform_indices = @transform_2, window_bounds = array<i64: 64, 1>}, {pipeline_mode = #tpu.pipeline_mode<synchronous>, transform_indices = @transform_3, window_bounds = array<i64: 3, 64>}, {pipeline_mode = #tpu.pipeline_mode<synchronous>, transform_indices = @transform_4, window_bounds = array<i64: 3, 1>}, {transform_indices = @transform_5, window_bounds = array<i64: 3, 8>}]} {
    %c0 = arith.constant 0 : index
    %c0_0 = arith.constant 0 : index
    %0 = vector.load %arg1[%c0, %c0_0] : memref<4x8xf32, #tpu.memory_space<vmem>>, vector<4x8xf32>
    %c0_1 = arith.constant 0 : index
    %c0_2 = arith.constant 0 : index
    %1 = vector.load %arg2[%c0_1, %c0_2] : memref<64x4xf32, #tpu.memory_space<vmem>>, vector<64x4xf32>
    %cst = arith.constant dense<0.000000e+00> : vector<64x8xf32>
    %2 = tpu.matmul %1, %0, %cst {dimension_numbers = #tpu.dot_dimension_numbers<[1], [0], [0], [1], [0, 0, 1, 1], [], []>} : vector<64x4xf32>, vector<4x8xf32>, vector<64x8xf32> -> vector<64x8xf32>
    %c0_3 = arith.constant 0 : index
    %c0_4 = arith.constant 0 : index
    %3 = vector.load %arg3[%c0_3, %c0_4] : memref<64x1xf32, #tpu.memory_space<vmem>>, vector<64x1xf32>
    %4 = vector.broadcast %3 : vector<64x1xf32> to vector<64x8xf32>
    %5 = arith.addf %2, %4 : vector<64x8xf32>
    %cst_5 = arith.constant 0.000000e+00 : f32
    %6 = vector.broadcast %cst_5 : f32 to vector<64x8xf32>
    %7 = arith.maximumf %5, %6 : vector<64x8xf32>
    %c0_6 = arith.constant 0 : index
    %c0_7 = arith.constant 0 : index
    %8 = vector.load %arg4[%c0_6, %c0_7] : memref<3x64xf32, #tpu.memory_space<vmem>>, vector<3x64xf32>
    %cst_8 = arith.constant dense<0.000000e+00> : vector<3x8xf32>
    %9 = tpu.matmul %8, %7, %cst_8 {dimension_numbers = #tpu.dot_dimension_numbers<[1], [0], [0], [1], [0, 0, 1, 1], [], []>} : vector<3x64xf32>, vector<64x8xf32>, vector<3x8xf32> -> vector<3x8xf32>
    %c0_9 = arith.constant 0 : index
    %c0_10 = arith.constant 0 : index
    %10 = vector.load %arg5[%c0_9, %c0_10] : memref<3x1xf32, #tpu.memory_space<vmem>>, vector<3x1xf32>
    %11 = vector.broadcast %10 : vector<3x1xf32> to vector<3x8xf32>
    %12 = arith.addf %9, %11 : vector<3x8xf32>
    %c0_11 = arith.constant 0 : index
    %c0_12 = arith.constant 0 : index
    %13 = vector.load %arg6[%c0_11, %c0_12] : memref<3x8xf32, #tpu.memory_space<vmem>>, vector<3x8xf32>
    tpu.vector_store %arg6[%c0_11, %c0_12], %12 {strides = array<i32>} : memref<3x8xf32, #tpu.memory_space<vmem>>, vector<3x8xf32>,
    return
  }
  func.func @transform_0(%arg0: i32) -> (i32, i32) {
    %c0_i32 = arith.constant 0 : i32
    %c0_i32_0 = arith.constant 0 : i32
    return %c0_i32, %arg0 : i32, i32
  }
  func.func @transform_1(%arg0: i32) -> (i32, i32) {
    %c0_i32 = arith.constant 0 : i32
    %c0_i32_0 = arith.constant 0 : i32
    %c0_i32_1 = arith.constant 0 : i32
    return %c0_i32, %c0_i32_0 : i32, i32
  }
  func.func @transform_2(%arg0: i32) -> (i32, i32) {
    %c0_i32 = arith.constant 0 : i32
    %c0_i32_0 = arith.constant 0 : i32
    %c0_i32_1 = arith.constant 0 : i32
    return %c0_i32, %c0_i32_0 : i32, i32
  }
  func.func @transform_3(%arg0: i32) -> (i32, i32) {
    %c0_i32 = arith.constant 0 : i32
    %c0_i32_0 = arith.constant 0 : i32
    %c0_i32_1 = arith.constant 0 : i32
    return %c0_i32, %c0_i32_0 : i32, i32
  }
  func.func @transform_4(%arg0: i32) -> (i32, i32) {
    %c0_i32 = arith.constant 0 : i32
    %c0_i32_0 = arith.constant 0 : i32
    %c0_i32_1 = arith.constant 0 : i32
    return %c0_i32, %c0_i32_0 : i32, i32
  }
  func.func @transform_5(%arg0: i32) -> (i32, i32) {
    %c0_i32 = arith.constant 0 : i32
    %c0_i32_0 = arith.constant 0 : i32
    return %c0_i32, %arg0 : i32, i32
  }
}

</mosaic_0001>

<bundles_post_ra>
// kernel: tpu_custom_call.1
= control target key start
LH: loop header
LB: loop body
LE: loop exit
PB: predicated region body
PF: predicated region fallthrough
CT: control target
= control target key end

     0   :  { %vm103_vm0 = vcmask 1043456   ;;  %vm78_vm1 = vcmask 31744   ;;  %v421_v4 = vmov 0   ;;  %s533_s0 = inlined_call_operand.vmem [shape: f32[4,8], index: 0, kind: input, shape index: {}]   ;;  %s534_s1 = inlined_call_operand.vmem [shape: f32[64,4], index: 1, kind: input, shape index: {}]   ;;  %s535_s2 = inlined_call_operand.vmem [shape: f32[64,1], index: 2, kind: input, shape index: {}]   ;;  %s536_s3 = inlined_call_operand.vmem [shape: f32[3,64], index: 3, kind: input, shape index: {}]   ;;  %s537_s4 = inlined_call_operand.vmem [shape: f32[3,1], index: 4, kind: input, shape index: {}]   ;;  %s538_s5 = inlined_call_operand.hbm [shape: f32[3,8], index: 5, kind: output, shape index: {}]  }
   0x1   :  { %v21_v0 = vld [vmem:[%s533_s0] sm:$0xf]  ;;  %v23_v2 = vld [vmem:[%s534_s1 + $0x8] sm:$0xff]  ;;  %v24_v3 = vld [vmem:[%s534_s1 + $0x10] sm:$0xff]  ;;  %395 = vset.pattern.permute.xlu0 %v421_v4  ;;  %396 = vset.pattern.permute.xlu1 %v421_v4 }
   0x2   :  { %v22_v1 = vld [vmem:[%s534_s1] sm:$0xff]  ;;  %345 = vmatprep.subr.msk.mxu0 %vm103_vm0, %v21_v0  ;;  %v32_v6 = vld [vmem:[%s535_s2 + $0x10] sm:$0xff]  ;;  %v25_v7 = vld [vmem:[%s534_s1 + $0x18] sm:$0xff] }
   0x3   :  { %347 = vmatprep.mubr.msk.f32.mxu0 %vm78_vm1, %v22_v1  ;;  %346 = vmatpush3.msk.msra.mxu0 %vm103_vm0, %v21_v0  ;;  %v30_v5 = vld [vmem:[%s535_s2] sm:$0xff]  ;;  %v31_v9 = vld [vmem:[%s535_s2 + $0x8] sm:$0xff]  ;;  %v33_v10 = vld [vmem:[%s535_s2 + $0x18] sm:$0xff] }
   0x4   :  { %348 = vmatmul.mubr.msk.f32.vlgmr.msra.gmra.mrb[0].mxu0 %vm78_vm1, %v23_v2  ;;  %40 = vperm.xlu0 %395, %v30_v5   ;;  %v26_v8 = vld [vmem:[%s534_s1 + $0x20] sm:$0xff] }
   0x5   :  { %350 = vmatprep.mubr.msk.f32.mxu0 %vm78_vm1, %v24_v3  ;;  %50 = vperm.xlu1 %396, %v32_v6  }
   0x6   :  { %10 = vsyncpa [#allocation3], 0  ;;  %v27_v11 = vld [vmem:[%s534_s1 + $0x28] sm:$0xff]  ;;  %v28_v12 = vld [vmem:[%s534_s1 + $0x30] sm:$0xff]  ;;  %v422_v19 = vmov 0.0|0.0   ;;  %vm423_vm2 = vmmov 0  }
   0x7   :  { %v34_v13 = vld [vmem:[%s535_s2 + $0x20] sm:$0xff]  ;;  %v35_v14 = vld [vmem:[%s535_s2 + $0x28] sm:$0xff]  ;;  %v29_v15 = vld [vmem:[%s534_s1 + $0x38] sm:$0xff]  ;;  %378 = vmatprep.subr.bf16.mxu1 %v422_v19  ;;  %v424_v20 = vmov 0.0   ;;  %vm227_vm3 = vcmask 523264   ;;  %vm301_vm4 = vcmask 59392  }
   0x8   :  { %351 = vmatmul.mubr.msk.f32.gmra.mrb[2].mxu0 %vm78_vm1, %v25_v7  ;;  %45 = vperm.xlu0 %395, %v31_v9   ;;  %v36_v16 = vld [vmem:[%s535_s2 + $0x30] sm:$0xff]  ;;  %v37_v17 = vld [vmem:[%s535_s2 + $0x38] sm:$0xff]  ;;  %v221_v18 = vld [vmem:[%s537_s4] sm:$0x7]  ;;  %s425_s4 = smov [#allocation2]  }
   0x9   :  { %353 = vmatprep.mubr.msk.f32.mxu0 %vm78_vm1, %v26_v8  ;;  %55 = vperm.xlu1 %396, %v33_v10   ;;  %v220_v57 = vld [vmem:[%s536_s3] sm:$0x7]  ;;  %s309_s27 = sshll.u32 %s425_s4, 4  ;;  %s310_s27 = int_to_ptr.vmem [resolvable:$true] %s309_s27 }
   0xa   :  { %375 = vmatprep.mubr.msk.f32.mxu1 %vm423_vm2, %v424_v20  ;;  %s397_s28 = scalar_lea.vmem %s310_s27, 64  ;;  %p402_p1 = scmp.lt.s32.totalorder %s310_s27, %s310_s27 }
   0xb   :  { %p398_p0 = scmp.ne.s32.totalorder %s310_s27, %s397_s28  ;;  %p403_p2 = scmp.lt.s32.totalorder %s397_s28, %s397_s28 }
   0xc   :  { %354 = vmatmul.mubr.msk.f32.gmra.mrb[4].mxu0 %vm78_vm1, %v27_v11  ;;  %60 = vperm.xlu0 %395, %v34_v13  }
   0xd   :  { %356 = vmatprep.mubr.msk.f32.mxu0 %vm78_vm1, %v28_v12  ;;  %65 = vperm.xlu1 %396, %v35_v14   ;;  %p404_p3 = por %p403_p2, %p402_p1 }
   0xf   :  { %p405_p4 = pnand %p404_p3, %p398_p0 }
  0x10   :  { %357 = vmatmul.mubr.msk.f32.gmra.mrb[6].mxu0 %vm78_vm1, %v29_v15  ;;  %70 = vperm.xlu0 %395, %v36_v16  }
  0x11   :  { %75 = vperm.xlu1 %396, %v37_v17  }
  0x14   :  { %224 = vperm.xlu0 %395, %v221_v18  }
  0x83   :  { %v41_v21 = vpop.permute.xlu0 %40 }
  0x84   :  { %v51_v22 = vpop.permute.xlu1 %50 }
  0x87   :  { %v46_v23 = vpop.permute.xlu0 %45 }
  0x88   :  { %v56_v24 = vpop.permute.xlu1 %55 }
  0x8b   :  { %v61_v37 = vpop.permute.xlu0 %60 }
  0x8c   :  { %v66_v34 = vpop.permute.xlu1 %65 }
  0x8f   :  { %v71_v49 = vpop.permute.xlu0 %70 }
  0x90   :  { %v76_v46 = vpop.permute.xlu1 %75 }
  0x93   :  { %v225_v58 = vpop.permute.xlu0 %224 }
  0xd7   :  { %v349_v25 = vpop.f32.mrb[0].mxu0 }
  0xd8   :  { %v179_v26 = vadd.f32 %v349_v25, %v46_v23  ;;  %v173_v27 = vpop.f32.mrb[1].mxu0 }
  0xd9   :  { %v174_v28 = vadd.f32 %v173_v27, %v41_v21 }
  0xda   :  { %v213_v29 = vmax.f32 %v179_v26, 0.0 }
  0xdb   :  { %v212_v30 = vmax.f32 %v174_v28, 0.0  ;;  %v352_v31 = vpop.f32.mrb[2].mxu0 }
  0xdc   :  { %v189_v32 = vadd.f32 %v352_v31, %v56_v24  ;;  %v183_v33 = vpop.f32.mrb[3].mxu0 }
  0xdd   :  { %v184_v35 = vadd.f32 %v183_v33, %v51_v22  ;;  %v379_v36 = vpack.c.bf16 %v213_v29, %v212_v30 }
  0xde   :  { %v215_v38 = vmax.f32 %v189_v32, 0.0 }
  0xdf   :  { %v214_v39 = vmax.f32 %v184_v35, 0.0  ;;  %v355_v40 = vpop.f32.mrb[4].mxu0  ;;  %380 = vmatpush3.bf16.msra.mxu1 %v379_v36 }
  0xe0   :  { %v199_v41 = vadd.f32 %v355_v40, %v66_v34  ;;  %v193_v42 = vpop.f32.mrb[5].mxu0  ;;  %381 = vmatprep.subr.bf16.mxu1 %v422_v19 }
  0xe1   :  { %v382_v43 = vpack.c.bf16 %v215_v38, %v214_v39  ;;  %v194_v44 = vadd.f32 %v193_v42, %v61_v37 }
  0xe2   :  { %v217_v45 = vmax.f32 %v199_v41, 0.0 }
  0xe3   :  { %v216_v47 = vmax.f32 %v194_v44, 0.0  ;;  %v358_v48 = vpop.f32.mrb[6].mxu0  ;;  %383 = vmatpush3.bf16.msra.mxu1 %v382_v43 }
  0xe4   :  { %v209_v50 = vadd.f32 %v358_v48, %v76_v46  ;;  %v203_v51 = vpop.f32.mrb[7].mxu0  ;;  %384 = vmatprep.subr.bf16.mxu1 %v422_v19 }
  0xe5   :  { %v385_v52 = vpack.c.bf16 %v217_v45, %v216_v47  ;;  %v204_v53 = vadd.f32 %v203_v51, %v71_v49 }
  0xe6   :  { %v219_v54 = vmax.f32 %v209_v50, 0.0 }
  0xe7   :  { %v218_v55 = vmax.f32 %v204_v53, 0.0  ;;  %386 = vmatpush3.bf16.msra.mxu1 %v385_v52 }
  0xe8   :  { %387 = vmatprep.subr.bf16.mxu1 %v422_v19 }
  0xe9   :  { %v388_v56 = vpack.c.bf16 %v219_v54, %v218_v55 }
  0xeb   :  { %389 = vmatpush3.bf16.msra.mxu1 %v388_v56 }
  0xee   :  { %376 = vmatmul.mubr.msk.f32.vlgmr.msra.gmra.mrb[0].mxu1 %vm227_vm3, %v220_v57 }
 0x1c1   :  { %v297_v59 = vpop.f32.mrb[0].mxu1 }
 0x1c2   :  { %v298_v60 = vadd.f32 %v297_v59, %v225_v58  ;;  %v377_v61 = vpop.f32.mrb[1].mxu1 }
 0x1c4   :  { %302 = vst.msk [vmem:[#allocation2] sm:$0x7] %vm301_vm4, %v298_v60 }
 0x1c5   :  { %408 = shalt.err (!%p405_p4)
}
 0x1c6   :  { %s409_s30 = scalar_lea.hbm %s538_s5, 64 }
 0x1c7   :  { %p410_p5 = scmp.ne.s32.totalorder %s538_s5, %s409_s30  ;;  %p413_p6 = scmp.lt.u32.totalorder %s409_s30, %s538_s5 }
 0x1c9   :  { %p415_p7 = pnand %p413_p6, %p410_p5 }
 0x1cb   :  { %418 = shalt.err (!%p415_p7)
}
 0x1cc   :  { %312 = dma.vmem_to_hbm [thread:$0]  %s310_s27, 64, %s538_s5, [#allocation3]  }
 0x1cd   :  { %419 = dma.done.wait [#allocation3], 64  }
 0x1ce   :  { %420 = vsyncadd [#allocation3], 4294967232 }
 0x1cf   :  { %316 = vsyncpa [#allocation3], 1 }

</bundles_post_ra>
